<compile_context>
chip_gen: v6e
topology: v6e:2x2x1
jax: 0.10.0
libtpu: 0.0.40
codegen_flags: <defaults>
</compile_context>

<pallas_src>
import numpy as np
import jax
import jax.numpy as jnp
from jax.experimental import pallas as pl
from jax.experimental.pallas import tpu as pltpu


# ----------------------------------------------------------------------------
# helpers
# ----------------------------------------------------------------------------
def _ru(x, m):
    return (x + m - 1) // m * m


def _full_spec(shape):
    nd = len(shape)
    return pl.BlockSpec(shape, lambda i, nd=nd: (0,) * nd)


def _pick_tile(total, target, gran):
    """Largest multiple of `gran` <= target that divides `total` (total % gran == 0)."""
    t = max(gran, min(target, total))
    t = (t // gran) * gran
    while total % t:
        t -= gran
    return t


def _tpu_generation():
    try:
        kind = jax.devices()[0].device_kind.lower()
    except Exception:
        return 7
    for g in (7, 6, 5, 4):
        if "v%d" % g in kind:
            return g
    return 7  # unknown -> conservative VMEM budget


def _hw_config():
    gen = _tpu_generation()
    if gen >= 7:
        # v7x: 64 MiB VMEM per TC -> small blocks, second TC used via TN axis.
        return dict(tl=64, tn=128, ts=512, vmem_cap=44 << 20)
    # v5e / v6e (and v4): 128 MiB VMEM -> bigger blocks, fewer grid steps.
    return dict(tl=256, tn=256, ts=1024, vmem_cap=100 << 20)


# ----------------------------------------------------------------------------
# kernel 1: text encoder (linear + relu) -> bf16 text [B,Sp,Dp] + tmean [B,Dp]
#   grid (B, Sp/TS): batch "parallel", seq "arbitrary" (tmean accumulator).
# ----------------------------------------------------------------------------
def text_encoder_pallas(emb_pad_bf16, w_enc_bf16, b_enc_f32, row_mask,
                        s_real, cfg):
    B, Sp, E = emb_pad_bf16.shape
    Dp = w_enc_bf16.shape[1]
    TS = _pick_tile(Sp, cfg["ts"], 8)
    num_s = Sp // TS
    inv_s = 1.0 / float(s_real)

    def kernel(x_ref, w_ref, b_ref, m_ref, o_ref, mean_ref):
        y = jnp.dot(x_ref[0], w_ref[...],
                    preferred_element_type=jnp.float32)         # [TS, Dp]
        y = jnp.maximum(y + b_ref[...], 0.0) * m_ref[...]        # zero pad rows
        o_ref[0] = y.astype(jnp.bfloat16)                        # bf16 writeback

        part = jnp.sum(y, axis=0, keepdims=True) * inv_s         # [1, Dp]
        j = pl.program_id(1)

        @pl.when(j == 0)
        def _():
            mean_ref[0] = part

        @pl.when(j > 0)
        def _():
            mean_ref[0] = mean_ref[0] + part

    est = (2 * (TS * E * 2 + TS * Dp * 2 + TS * 4)
           + E * Dp * 2 + Dp * 4 + 2 * Dp * 4
           + 4 * TS * Dp * 4)                                    # temporaries
    vmem = int(min(max(est + (4 << 20), 16 << 20), cfg["vmem_cap"]))

    text, tmean3 = pl.pallas_call(
        kernel,
        out_shape=(jax.ShapeDtypeStruct((B, Sp, Dp), jnp.bfloat16),
                   jax.ShapeDtypeStruct((B, 1, Dp), jnp.float32)),
        grid=(B, num_s),
        in_specs=[
            pl.BlockSpec((1, TS, E), lambda b, j: (b, j, 0)),
            pl.BlockSpec((E, Dp), lambda b, j: (0, 0)),
            pl.BlockSpec((1, Dp), lambda b, j: (0, 0)),
            pl.BlockSpec((TS, 1), lambda b, j: (j, 0)),
        ],
        out_specs=(
            pl.BlockSpec((1, TS, Dp), lambda b, j: (b, j, 0)),
            pl.BlockSpec((1, 1, Dp), lambda b, j: (b, 0, 0)),
        ),
        compiler_params=pltpu.CompilerParams(
            dimension_semantics=("parallel", "arbitrary"),
            vmem_limit_bytes=vmem),
    )(emb_pad_bf16, w_enc_bf16, b_enc_f32, row_mask)
    return text, tmean3.reshape(B, Dp)


# ----------------------------------------------------------------------------
# kernel 2: HiAGM-LA label attention + classifier logits
#   text [B,Sp,Dp] bf16 (resident), labels^T [Dp,TL], W_cls [TL,Dp,TN]
#   streamed over a (TN "parallel", TL "arbitrary") grid -> logits [B,Lp].
# ----------------------------------------------------------------------------
def label_attention_pallas(text_bf16, labT_bf16, wcls_bf16, bcls_f32,
                           smask_2d, cfg):
    B, Sp, Dp = text_bf16.shape
    Lp = labT_bf16.shape[1]
    TL = _pick_tile(Lp, cfg["tl"], 128)
    TN = _pick_tile(Lp, cfg["tn"], 128)

    def est_bytes(tl, tn):
        return (2 * B * Sp * Dp * 2          # text block (bf16, const index)
                + 2 * Dp * tl * 2            # labels^T block
                + 2 * tl * Dp * tn * 2       # streamed W_cls block
                + 2 * tn * 4 + 2 * B * Sp * 4
                + 2 * B * tn * 4             # logits accumulator
                + 4 * B * Sp * tl * 4        # scores / exp / attn temporaries
                + 2 * B * tl * Dp * 4)       # label-aware features (+bf16)

    budget = cfg["vmem_cap"] - (6 << 20)
    while est_bytes(TL, TN) > budget and (TL > 128 or TN > 128):
        if TL >= TN and TL > 128:
            TL = _pick_tile(Lp, TL // 2, 128)
        else:
            TN = _pick_tile(Lp, TN // 2, 128)
    num_l, num_n = Lp // TL, Lp // TN

    def kernel(t_ref, labT_ref, wcls_ref, bcls_ref, mask_ref, logits_ref):
        l_idx = pl.program_id(1)
        t = t_ref[...]                                            # [B,Sp,Dp] bf16

        # flattened [B*Sp, Dp] x [Dp, TL] score matmul + hoisted pad mask
        s2d = jnp.dot(t.reshape(B * Sp, Dp), labT_ref[...],
                      preferred_element_type=jnp.float32)
        s2d = s2d + mask_ref[...]                                 # [B*Sp, TL]
        scores = s2d.reshape(B, Sp, TL)

        m = jnp.max(scores, axis=1, keepdims=True)
        e = jnp.exp(scores - m)
        denom = jnp.sum(e, axis=1, keepdims=True)
        attn = (e / denom).astype(jnp.bfloat16)                   # exact softmax

        # label-aware features, then one [B, TL*Dp] x [TL*Dp, TN] MXU matmul.
        la = jnp.einsum("bsl,bsd->bld", attn, t,
                        preferred_element_type=jnp.float32)       # [B,TL,Dp]
        # TODO(synk): multi-contracting dot_general would skip this relayout;
        # kept reshape+2D dot for guaranteed Mosaic lowering (DMA-bound anyway).
        contrib = jnp.dot(la.astype(jnp.bfloat16).reshape(B, TL * Dp),
                          wcls_ref[...].reshape(TL * Dp, TN),
                          preferred_element_type=jnp.float32)     # [B, TN]

        @pl.when(l_idx == 0)
        def _():
            logits_ref[...] = bcls_ref[...] + contrib

        @pl.when(l_idx > 0)
        def _():
            logits_ref[...] += contrib

    vmem = int(min(max(est_bytes(TL, TN) + (4 << 20), 16 << 20),
                   cfg["vmem_cap"]))
    return pl.pallas_call(
        kernel,
        out_shape=jax.ShapeDtypeStruct((B, Lp), jnp.float32),
        grid=(num_n, num_l),                                      # reduction last
        in_specs=[
            pl.BlockSpec((B, Sp, Dp), lambda n, l: (0, 0, 0)),
            pl.BlockSpec((Dp, TL), lambda n, l: (0, l)),
            pl.BlockSpec((TL, Dp, TN), lambda n, l: (l, 0, n)),   # streamed
            pl.BlockSpec((1, TN), lambda n, l: (0, n)),
            pl.BlockSpec((B * Sp, 1), lambda n, l: (0, 0)),
        ],
        out_specs=pl.BlockSpec((B, TN), lambda n, l: (0, n)),
        compiler_params=pltpu.CompilerParams(
            dimension_semantics=("parallel", "arbitrary"),
            vmem_limit_bytes=vmem),
    )(text_bf16, labT_bf16, wcls_bf16, bcls_f32, smask_2d)


# ----------------------------------------------------------------------------
# kernel 3 (fused): similarity loss + label-prior discriminator loss +
#                   label-prior weight head, three (1,1) scalar outputs.
# ----------------------------------------------------------------------------
def fused_losses_pallas(tmean, pos_max, neg_mean, disc_in,
                        w0, b0, w1, b1, w2_row, b2, wlpw, blpw,
                        l_real, cfg):
    B = tmean.shape[0]
    Lp = disc_in.shape[0] // 2

    def kernel(tm_ref, pos_ref, neg_ref, disc_ref,
               w0_ref, b0_ref, w1_ref, b1_ref, w2_ref, b2_ref,
               wlpw_ref, blpw_ref,
               sim_ref, ploss_ref, lpw_ref):
        # ---- cosine-similarity loss (tmean comes from kernel 1) ----------
        tmean_v = tm_ref[...]                              # [B, Dp] f32

        def _cos(a, b):
            num = jnp.sum(a * b, axis=-1, keepdims=True)
            na = jnp.sqrt(jnp.sum(a * a, axis=-1, keepdims=True))
            nb = jnp.sqrt(jnp.sum(b * b, axis=-1, keepdims=True))
            den = jnp.maximum(na * nb, 1e-8)
            return num * pl.reciprocal(den, approx=True)   # [B,1]

        pos_sim = _cos(tmean_v, pos_ref[...])
        neg_sim = _cos(tmean_v, neg_ref[...])
        # mirror the "if not torch.isnan(...)" guards of the reference
        pos_sim = jnp.where(jnp.isnan(pos_sim), 0.0, pos_sim)
        neg_sim = jnp.where(jnp.isnan(neg_sim), 0.0, neg_sim)
        sim_ref[...] = jnp.sum(neg_sim - pos_sim, keepdims=True) * (1.0 / B)

        # ---- label-prior discriminator loss -------------------------------
        x = disc_ref[...]                                  # [2*Lp, Dp] f32
        h = jnp.dot(x.astype(jnp.bfloat16), w0_ref[...],
                    preferred_element_type=jnp.float32) + b0_ref[...]
        h = jnp.maximum(h, 0.0)
        h = jnp.dot(h.astype(jnp.bfloat16), w1_ref[...],
                    preferred_element_type=jnp.float32) + b1_ref[...]
        h = jnp.maximum(h, 0.0)
        d_logit = (jnp.sum(h * w2_ref[...], axis=-1, keepdims=True)
                   + b2_ref[...])                          # [2*Lp, 1]

        def _softplus(z):
            return jnp.maximum(z, 0.0) + jnp.log(1.0 + jnp.exp(-jnp.abs(z)))

        prior_logit = d_logit[:Lp, :]
        label_logit = d_logit[Lp:, :]
        # log(sigmoid(x)) = -softplus(-x); log(1-sigmoid(x)) = -softplus(x)
        term = -_softplus(-prior_logit) - _softplus(label_logit)    # [Lp,1]
        lmask = (jax.lax.broadcasted_iota(jnp.int32, (Lp, 1), 0)
                 < l_real).astype(jnp.float32)
        ploss_ref[...] = (-jnp.sum(term * lmask, keepdims=True)
                          * (1.0 / l_real))

        # ---- label-prior weight head ---------------------------------------
        lab = x[Lp:, :]                                    # [Lp, Dp]
        logit = jnp.sum(lab * wlpw_ref[...], keepdims=True) + blpw_ref[...]
        lpw_ref[...] = jax.nn.sigmoid(logit)

    args = (tmean, pos_max, neg_mean, disc_in,
            w0, b0, w1, b1, w2_row, b2, wlpw, blpw)
    est = sum(int(np.prod(a.shape)) * a.dtype.itemsize for a in args) * 2
    vmem = int(min(max(est + (4 << 20), 16 << 20), cfg["vmem_cap"]))
    return pl.pallas_call(
        kernel,
        out_shape=tuple(jax.ShapeDtypeStruct((1, 1), jnp.float32)
                        for _ in range(3)),
        grid=(1,),
        in_specs=[_full_spec(a.shape) for a in args],
        out_specs=tuple(_full_spec((1, 1)) for _ in range(3)),
        compiler_params=pltpu.CompilerParams(
            dimension_semantics=("arbitrary",),
            vmem_limit_bytes=vmem),
    )(*args)


# ----------------------------------------------------------------------------
# parameter setup (natural shapes) + one-time padded/bf16 preparation
# ----------------------------------------------------------------------------
def init_params(key, V, E, D, L, H1, H2):
    ks = jax.random.split(key, 12)
    p = {}
    p["emb_table"] = jax.random.normal(ks[0], (V, E), jnp.float32) * 0.1
    p["w_enc"] = jax.random.normal(ks[1], (E, D), jnp.float32) * (1.0 / np.sqrt(E))
    p["b_enc"] = jnp.zeros((1, D), jnp.float32)
    p["label_emb"] = jax.random.normal(ks[2], (L, D), jnp.float32) * 0.1
    # classifier Linear(L*D, L) stored as [L, D, L] (row-major flatten over l,d)
    p["w_cls3"] = jax.random.normal(ks[3], (L, D, L), jnp.float32) * (1.0 / np.sqrt(L * D))
    p["b_cls"] = jnp.zeros((1, L), jnp.float32)
    # label-prior discriminator MLP: D -> H1 -> H2 -> 1
    p["w0"] = jax.random.normal(ks[4], (D, H1), jnp.float32) * (1.0 / np.sqrt(D))
    p["b0"] = jnp.zeros((1, H1), jnp.float32)
    p["w1"] = jax.random.normal(ks[5], (H1, H2), jnp.float32) * (1.0 / np.sqrt(H1))
    p["b1"] = jnp.zeros((1, H2), jnp.float32)
    p["w2_row"] = jax.random.normal(ks[6], (1, H2), jnp.float32) * (1.0 / np.sqrt(H2))
    p["b2"] = jnp.zeros((1, 1), jnp.float32)
    # labelpriorweight_linear: Linear(L*D, 1)
    p["w_lpw_row"] = jax.random.normal(ks[7], (1, L * D), jnp.float32) * (1.0 / np.sqrt(L * D))
    p["b_lpw"] = jnp.zeros((1, 1), jnp.float32)
    # label_weight_estimator exists in __init__ but is unused in forward.
    return p


def prepare_params(p, L, D, H1, H2):
    """Zero-pad lane dims to multiples of 128 and cast matmul weights to bf16."""
    Dp, Lp = _ru(D, 128), _ru(L, 128)
    H1p, H2p = _ru(H1, 128), _ru(H2, 128)
    q = {"emb_table": p["emb_table"]}
    q["w_enc"] = jnp.pad(p["w_enc"], ((0, 0), (0, Dp - D))).astype(jnp.bfloat16)
    q["b_enc"] = jnp.pad(p["b_enc"], ((0, 0), (0, Dp - D)))
    lab = jnp.pad(p["label_emb"], ((0, Lp - L), (0, Dp - D)))
    q["label_emb_pad"] = lab                                        # [Lp,Dp] f32
    q["labT_bf"] = lab.T.astype(jnp.bfloat16)                       # [Dp,Lp]
    q["w_cls_pad"] = jnp.pad(p["w_cls3"],
                             ((0, Lp - L), (0, Dp - D), (0, Lp - L))
                             ).astype(jnp.bfloat16)                 # [Lp,Dp,Lp]
    q["b_cls_pad"] = jnp.pad(p["b_cls"], ((0, 0), (0, Lp - L)))
    q["w0"] = jnp.pad(p["w0"], ((0, Dp - D), (0, H1p - H1))).astype(jnp.bfloat16)
    q["b0"] = jnp.pad(p["b0"], ((0, 0), (0, H1p - H1)))
    q["w1"] = jnp.pad(p["w1"], ((0, H1p - H1), (0, H2p - H2))).astype(jnp.bfloat16)
    q["b1"] = jnp.pad(p["b1"], ((0, 0), (0, H2p - H2)))
    q["w2_row"] = jnp.pad(p["w2_row"], ((0, 0), (0, H2p - H2)))
    q["b2"] = p["b2"]
    q["w_lpw_pad"] = jnp.pad(p["w_lpw_row"].reshape(L, D),
                             ((0, Lp - L), (0, Dp - D)))            # [Lp,Dp]
    q["b_lpw"] = p["b_lpw"]
    q["dims"] = {"L": L, "D": D, "Lp": Lp, "Dp": Dp}
    return q


# ----------------------------------------------------------------------------
# forward glue
# ----------------------------------------------------------------------------
def aesmnsmlc_forward(prep, batch, label_map, tagmaster, prior_key):
    cfg = _hw_config()
    dims = prep["dims"]
    L, D, Lp, Dp = dims["L"], dims["D"], dims["Lp"], dims["Dp"]
    B, S = batch["token"].shape
    Sp = _ru(S, 8)

    # --- text encoder (bf16 text in final padded layout + tmean) -------------
    emb = jnp.take(prep["emb_table"], batch["token"], axis=0)       # [B,S,E]
    emb = emb.astype(jnp.bfloat16)
    if Sp != S:
        emb = jnp.pad(emb, ((0, 0), (0, Sp - S), (0, 0)))
    row_mask = (jnp.arange(Sp) < S).astype(jnp.float32).reshape(Sp, 1)
    text, tmean = text_encoder_pallas(emb, prep["w_enc"], prep["b_enc"],
                                      row_mask, S, cfg)             # bf16, f32

    # --- HiAGMLA: label features + logits -------------------------------------
    all_labels_feature = prep["label_emb_pad"]                      # [Lp,Dp]
    # hoisted additive pad mask for attention scores: 0 for real rows, -1e30 pad
    smask = jnp.where(jnp.arange(Sp) < S, 0.0, -1e30).astype(jnp.float32)
    smask_2d = jnp.tile(smask.reshape(Sp, 1), (B, 1))               # [B*Sp,1]
    logits_pad = label_attention_pallas(
        text, prep["labT_bf"], prep["w_cls_pad"], prep["b_cls_pad"],
        smask_2d, cfg)
    logits = logits_pad[:, :L]

    # negative_text is computed in the reference but never used downstream.
    idx = np.random.permutation(B)
    _negative_text = text[idx, :, :]

    # --- similarity loss (host-side ragged gather, Pallas reduction) ---------
    pos_rows, neg_rows = [], []
    for label_index, labels_nestedlist in zip(batch["label_list"],
                                              batch["label_nestedlist"]):
        lf = all_labels_feature[jnp.asarray(label_index, jnp.int32)]
        pos_rows.append(jnp.max(lf, axis=0))            # topk(k=1).squeeze(0)

        neg_ids = []
        for each_group in labels_nestedlist:
            groupid, tagids = each_group[0], each_group[1:]
            if groupid in tagmaster:
                cands = [x for x in tagmaster[groupid] if x not in tagids]
                if len(cands) != 0:
                    equal_probs = [1.0 / len(cands)] * len(cands)
                    n = min(len(tagids), len(cands))
                    sel = np.random.choice(np.arange(len(cands)), size=n,
                                           p=equal_probs)
                    neg_ids += [label_map[cands[s]] for s in sel]
        if len(neg_ids) == 0:
            # torch.mean over an empty set -> NaN; masked inside the kernel.
            neg_rows.append(jnp.full((Dp,), jnp.nan, jnp.float32))
        else:
            nf = all_labels_feature[jnp.asarray(neg_ids, jnp.int32)]
            neg_rows.append(jnp.mean(nf, axis=0))
    pos_max = jnp.stack(pos_rows)                       # [B,Dp]
    neg_mean = jnp.stack(neg_rows)                      # [B,Dp]

    # --- label prior (random uniform over the real [L,D] region) --------------
    prior = jax.random.uniform(prior_key, (L, D), jnp.float32)
    prior_pad = jnp.pad(prior, ((0, Lp - L), (0, Dp - D)))
    disc_in = jnp.concatenate([prior_pad, all_labels_feature], axis=0)  # [2Lp,Dp]

    sim_loss, prior_loss, lp_weight = fused_losses_pallas(
        tmean, pos_max, neg_mean, disc_in,
        prep["w0"], prep["b0"], prep["w1"], prep["b1"],
        prep["w2_row"], prep["b2"], prep["w_lpw_pad"], prep["b_lpw"],
        l_real=L, cfg=cfg)

    return (sim_loss[0, 0], prior_loss[0, 0], logits, lp_weight.reshape(1))


# ----------------------------------------------------------------------------
# main
# ----------------------------------------------------------------------------
if __name__ == "__main__":
    np.random.seed(0)
    key = jax.random.PRNGKey(0)
    k_param, k_tok, k_prior = jax.random.split(key, 3)

    B, S, V, E, D, L = 2, 8, 50, 32, 32, 8
    H1, H2 = 64, 32

    params = init_params(k_param, V, E, D, L, H1, H2)
    prep = prepare_params(params, L=L, D=D, H1=H1, H2=H2)

    # synthetic label vocabulary / tagmaster (stands in for tagmaster_154.json)
    label_map = {f"tag{i}": i for i in range(L)}
    tagmaster = {"g0": ["tag0", "tag1", "tag2", "tag3"],
                 "g1": ["tag4", "tag5", "tag6", "tag7"]}

    batch = {
        "token": jax.random.randint(k_tok, (B, S), 0, V, dtype=jnp.int32),
        "token_len": [S] * B,
        "label_list": [[0, 1], [4, 5]],
        "label_nestedlist": [[["g0", "tag0", "tag1"]],
                             [["g1", "tag4", "tag5"]]],
    }

    sim_loss, prior_loss, logits, lp_weight = aesmnsmlc_forward(
        prep, batch, label_map, tagmaster, k_prior)

    jax.block_until_ready((sim_loss, prior_loss, logits, lp_weight))
    assert logits.shape == (B, L)
    assert lp_weight.shape == (1,)
    print("KERNEL_OK")
</pallas_src>

<mosaic_0001>
module attributes {stable_mosaic.version = 11 : i64} {
  func.func @kernel(%arg0: i32, %arg1: i32, %arg2: memref<1x8x32xbf16, #tpu.memory_space<vmem>>, %arg3: memref<32x128xbf16, #tpu.memory_space<vmem>>, %arg4: memref<1x128xf32, #tpu.memory_space<vmem>>, %arg5: memref<8x1xf32, #tpu.memory_space<vmem>>, %arg6: memref<1x8x128xbf16, #tpu.memory_space<vmem>>, %arg7: memref<1x1x128xf32, #tpu.memory_space<vmem>>) attributes {dimension_semantics = [#tpu.dimension_semantics<parallel>, #tpu.dimension_semantics<arbitrary>], iteration_bounds = array<i64: 2, 1>, scalar_prefetch = 0 : i64, scratch_operands = 0 : i64, tpu.core_type = #tpu.core_type<tc>, window_params = [{transform_indices = @transform_0, window_bounds = array<i64: 1, 8, 32>}, {pipeline_mode = #tpu.pipeline_mode<synchronous>, transform_indices = @transform_1, window_bounds = array<i64: 32, 128>}, {pipeline_mode = #tpu.pipeline_mode<synchronous>, transform_indices = @transform_2, window_bounds = array<i64: 1, 128>}, {transform_indices = @transform_3, window_bounds = array<i64: 8, 1>}, {transform_indices = @transform_4, window_bounds = array<i64: 1, 8, 128>}, {transform_indices = @transform_5, window_bounds = array<i64: 1, 1, 128>}]} {
    %c0 = arith.constant 0 : index
    %c0_0 = arith.constant 0 : index
    %c0_1 = arith.constant 0 : index
    %0 = vector.load %arg2[%c0, %c0_0, %c0_1] : memref<1x8x32xbf16, #tpu.memory_space<vmem>>, vector<1x8x32xbf16>
    %1 = vector.shape_cast %0 : vector<1x8x32xbf16> to vector<8x32xbf16>
    %c0_2 = arith.constant 0 : index
    %c0_3 = arith.constant 0 : index
    %2 = vector.load %arg3[%c0_2, %c0_3] : memref<32x128xbf16, #tpu.memory_space<vmem>>, vector<32x128xbf16>
    %cst = arith.constant dense<0.000000e+00> : vector<8x128xf32>
    %3 = tpu.matmul %1, %2, %cst {dimension_numbers = #tpu.dot_dimension_numbers<[1], [0], [0], [1], [0, 0, 1, 1], [], []>} : vector<8x32xbf16>, vector<32x128xbf16>, vector<8x128xf32> -> vector<8x128xf32>
    %c0_4 = arith.constant 0 : index
    %c0_5 = arith.constant 0 : index
    %4 = vector.load %arg4[%c0_4, %c0_5] : memref<1x128xf32, #tpu.memory_space<vmem>>, vector<1x128xf32>
    %5 = vector.broadcast %4 : vector<1x128xf32> to vector<8x128xf32>
    %6 = arith.addf %3, %5 : vector<8x128xf32>
    %cst_6 = arith.constant 0.000000e+00 : f32
    %7 = vector.broadcast %cst_6 : f32 to vector<8x128xf32>
    %8 = arith.maximumf %6, %7 : vector<8x128xf32>
    %c0_7 = arith.constant 0 : index
    %c0_8 = arith.constant 0 : index
    %9 = vector.load %arg5[%c0_7, %c0_8] : memref<8x1xf32, #tpu.memory_space<vmem>>, vector<8x1xf32>
    %10 = vector.broadcast %9 : vector<8x1xf32> to vector<8x128xf32>
    %11 = arith.mulf %8, %10 : vector<8x128xf32>
    %12 = arith.truncf %11 : vector<8x128xf32> to vector<8x128xbf16>
    %c0_9 = arith.constant 0 : index
    %c0_10 = arith.constant 0 : index
    %c0_11 = arith.constant 0 : index
    %13 = vector.load %arg6[%c0_9, %c0_10, %c0_11] : memref<1x8x128xbf16, #tpu.memory_space<vmem>>, vector<1x8x128xbf16>
    %14 = vector.shape_cast %13 : vector<1x8x128xbf16> to vector<8x128xbf16>
    %15 = vector.shape_cast %12 : vector<8x128xbf16> to vector<1x8x128xbf16>
    tpu.vector_store %arg6[%c0_9, %c0_10, %c0_11], %15 {strides = array<i32>} : memref<1x8x128xbf16, #tpu.memory_space<vmem>>, vector<1x8x128xbf16>,
    %cst_12 = arith.constant dense<0.000000e+00> : vector<128xf32>
    %16 = vector.multi_reduction <add>, %11, %cst_12 [0] : vector<8x128xf32> to vector<128xf32>
    %17 = vector.shape_cast %16 : vector<128xf32> to vector<1x128xf32>
    %cst_13 = arith.constant 1.250000e-01 : f32
    %18 = vector.broadcast %cst_13 : f32 to vector<1x128xf32>
    %19 = arith.mulf %17, %18 : vector<1x128xf32>
    %c0_i32 = arith.constant 0 : i32
    %20 = arith.cmpi eq, %arg1, %c0_i32 : i32
    %21 = arith.extui %20 : i1 to i32
    %c0_i32_14 = arith.constant 0 : i32
    %22 = arith.cmpi ne, %21, %c0_i32_14 : i32
    scf.if %22 {
      %c0_17 = arith.constant 0 : index
      %c0_18 = arith.constant 0 : index
      %c0_19 = arith.constant 0 : index
      %26 = vector.load %arg7[%c0_17, %c0_18, %c0_19] : memref<1x1x128xf32, #tpu.memory_space<vmem>>, vector<1x1x128xf32>
      %27 = vector.shape_cast %26 : vector<1x1x128xf32> to vector<1x128xf32>
      %28 = vector.shape_cast %19 : vector<1x128xf32> to vector<1x1x128xf32>
      tpu.vector_store %arg7[%c0_17, %c0_18, %c0_19], %28 {strides = array<i32>} : memref<1x1x128xf32, #tpu.memory_space<vmem>>, vector<1x1x128xf32>,
    } else {
    }
    %c0_i32_15 = arith.constant 0 : i32
    %23 = arith.cmpi sgt, %arg1, %c0_i32_15 : i32
    %24 = arith.extui %23 : i1 to i32
    %c0_i32_16 = arith.constant 0 : i32
    %25 = arith.cmpi ne, %24, %c0_i32_16 : i32
    scf.if %25 {
      %c0_17 = arith.constant 0 : index
      %c0_18 = arith.constant 0 : index
      %c0_19 = arith.constant 0 : index
      %26 = vector.load %arg7[%c0_17, %c0_18, %c0_19] : memref<1x1x128xf32, #tpu.memory_space<vmem>>, vector<1x1x128xf32>
      %27 = vector.shape_cast %26 : vector<1x1x128xf32> to vector<1x128xf32>
      %28 = arith.addf %27, %19 : vector<1x128xf32>
      %c0_20 = arith.constant 0 : index
      %c0_21 = arith.constant 0 : index
      %c0_22 = arith.constant 0 : index
      %29 = vector.load %arg7[%c0_20, %c0_21, %c0_22] : memref<1x1x128xf32, #tpu.memory_space<vmem>>, vector<1x1x128xf32>
      %30 = vector.shape_cast %29 : vector<1x1x128xf32> to vector<1x128xf32>
      %31 = vector.shape_cast %28 : vector<1x128xf32> to vector<1x1x128xf32>
      tpu.vector_store %arg7[%c0_20, %c0_21, %c0_22], %31 {strides = array<i32>} : memref<1x1x128xf32, #tpu.memory_space<vmem>>, vector<1x1x128xf32>,
    } else {
    }
    return
  }
  func.func @transform_0(%arg0: i32, %arg1: i32) -> (i32, i32, i32) {
    %c0_i32 = arith.constant 0 : i32
    %c0_i32_0 = arith.constant 0 : i32
    return %arg0, %arg1, %c0_i32 : i32, i32, i32
  }
  func.func @transform_1(%arg0: i32, %arg1: i32) -> (i32, i32) {
    %c0_i32 = arith.constant 0 : i32
    %c0_i32_0 = arith.constant 0 : i32
    %c0_i32_1 = arith.constant 0 : i32
    return %c0_i32, %c0_i32_0 : i32, i32
  }
  func.func @transform_2(%arg0: i32, %arg1: i32) -> (i32, i32) {
    %c0_i32 = arith.constant 0 : i32
    %c0_i32_0 = arith.constant 0 : i32
    %c0_i32_1 = arith.constant 0 : i32
    return %c0_i32, %c0_i32_0 : i32, i32
  }
  func.func @transform_3(%arg0: i32, %arg1: i32) -> (i32, i32) {
    %c0_i32 = arith.constant 0 : i32
    %c0_i32_0 = arith.constant 0 : i32
    return %arg1, %c0_i32 : i32, i32
  }
  func.func @transform_4(%arg0: i32, %arg1: i32) -> (i32, i32, i32) {
    %c0_i32 = arith.constant 0 : i32
    %c0_i32_0 = arith.constant 0 : i32
    return %arg0, %arg1, %c0_i32 : i32, i32, i32
  }
  func.func @transform_5(%arg0: i32, %arg1: i32) -> (i32, i32, i32) {
    %c0_i32 = arith.constant 0 : i32
    %c0_i32_0 = arith.constant 0 : i32
    %c0_i32_1 = arith.constant 0 : i32
    return %arg0, %c0_i32, %c0_i32_0 : i32, i32, i32
  }
}

</mosaic_0001>

<bundles_post_ra>
// kernel: tpu_custom_call.1
= control target key start
LH: loop header
LB: loop body
LE: loop exit
PB: predicated region body
PF: predicated region fallthrough
CT: control target
= control target key end

     0   :  { %11 = vsyncpa [#allocation3], 0  ;;  %s982_s0 = inlined_call_operand.vmem [shape: bf16[2,8,32], index: 0, kind: input, shape index: {}]   ;;  %s983_s1 = inlined_call_operand.hbm [shape: bf16[32,128], index: 1, kind: input, shape index: {}]   ;;  %s984_s2 = inlined_call_operand.vmem [shape: f32[1,128], index: 2, kind: input, shape index: {}]   ;;  %s985_s3 = inlined_call_operand.vmem [shape: f32[8,1], index: 3, kind: input, shape index: {}]   ;;  %s986_s4 = inlined_call_operand.hbm [shape: bf16[2,8,128], index: 4, kind: output, shape index: {0}]   ;;  %s987_s5 = inlined_call_operand.hbm [shape: f32[2,1,128], index: 5, kind: output, shape index: {1}]  }
   0x1   :  { %12 = vsyncpa [#allocation4], 0 }
   0x2   :  { %14 = vsyncpa [#allocation4 + $0x1], 0 }
   0x3   :  { %15 = vsyncpa [#allocation7], 0 }
   0x4   :  { %17 = vsyncpa [#allocation7 + $0x1], 0  ;;  %s828_s18 = smov 0   ;;  %s830_s19 = smov 0  }
   0x5   :  { %s832_s20 = smov 0   ;;  %s834_s21 = smov 0  }
   0x6   :  { %s836_s22 = smov 0   ;;  %s838_s23 = smov 0  }
   0x7 LB: > { %s543_s24 = sadd.s32 4294967295, %s788_s23   ;;  %s544_s25 = sadd.s32 4294967294, %s788_s23   ;;  %s788_s23 = sphi %s838_s23, %s23_s23   ;;  %s784_s22 = sphi %s836_s22, %s996_s22   ;;  %s780_s21 = sphi %s834_s21, %s995_s21   ;;  %s776_s20 = sphi %s832_s20, %s994_s20   ;;  %s772_s19 = sphi %s830_s19, %s993_s19   ;;  %s768_s18 = sphi %s828_s18, %s992_s18  }
   0x8   : > { %s35_s26 = sadd.s32 1, %s784_s22  ;;  %s140_s27 = sadd.s32 1, %s776_s20 }
   0x9   : > { %p37_p0 = scmp.ge.s32.totalorder %s35_s26, 2  ;;  %p150_p1 = scmp.ne.s32.totalorder %s776_s20, %s772_s19 }
   0xa   : > { %p151_p2 = scmp.eq.s32.totalorder %s543_s24, 1  ;;  %p156_p3 = scmp.ne.s32.totalorder %s772_s19, %s768_s18 }
   0xb   : > { %s998_s26 = smov (%p37_p0, %s35_s26), 0  ;;  %p157_p5 = scmp.eq.s32.totalorder %s544_s25, 1 }
   0xc   : > { %p868_p4 = por %p151_p2, %p150_p1  ;;  %s135_s29 = ssub.s32 %s784_s22, %s998_s26 }
   0xd   : > { %p545_p6 = scmp.ge.s32.totalorder %s788_s23, 1  ;;  %p138_p7 = scmp.eq.s32.totalorder %s135_s29, 0 }
   0xe   : > { %p875_p8 = por %p157_p5, %p156_p3  ;;  %p190_p9 = scmp.lt.s32.totalorder %s788_s23, 3 }
   0xf   : > { %s881_s6 = scalar_select %p138_p7, %s776_s20, %s140_s27  }
  0x10   : > { %p883_p10 = pnand %p545_p6, %p190_p9  ;;  %p887_p11 = scmp.eq.s32.totalorder %s543_s24, 0 }
  0x11   : > { %s790_s9 = smov [#allocation2]  }
  0x12   : > { %p581_p12 = pneg %p883_p10  ;;  %s202_s10 = sshll.u32 %s790_s9, 4  ;;  %s203_s10 = int_to_ptr.vmem [resolvable:$true] %s202_s10 }
  0x13   : > { %s663_s11 = scalar_lea.vmem %s203_s10, 256  ;;  %p671_p5 = scmp.lt.s32.totalorder %s203_s10, %s203_s10 }
  0x14   : > { %p582_p13 = pnand %p887_p11, %p581_p12  ;;  %p664_p1 = scmp.ne.s32.totalorder %s203_s10, %s663_s11 }
  0x15   : > { %p672_p6 = scmp.lt.s32.totalorder %s663_s11, %s663_s11 }
  0x16   : > { %p654_p0 = pneg %p582_p13 }
  0x17   : > { %p673_p7 = por %p672_p6, %p671_p5 }
  0x18   : > { %p666_p2 = pnand %p664_p1, %p654_p0 }
  0x1a   : > { %p667_p3 = pneg %p666_p2 }
  0x1c   : > { %p674_p9 = pnand %p673_p7, %p667_p3 }
  0x1e   : > { %677 = shalt.err (!%p674_p9)
}
  0x1f   : > { %s791_s12 = smov 64   ;;  %s792_s13 = smov 4  }
  0x20   : > { %584 = dma.hbm_to_vmem [thread:$0]  (!%p582_p13), %s983_s1, 256, %s203_s10, [#allocation3], %s791_s12, %s791_s12, %s792_s13  }
  0x21   : > { %238 = sbr.rel (%p883_p10) target bundleno = 286 (0x11e), region = 36 }
  0x26   : > { %755 = dma.done.wait (%p887_p11), [#allocation3], 256  }
  0x27   : > { %757 = vsyncadd (%p887_p11), [#allocation3], 4294967040  ;;  %p276_p12 = scmp.lt.s32.totalorder %s780_s21, 1  ;;  %v793_v0 = vmov 0.0   ;;  %vm794_vm0 = vmmov 0   ;;  %v795_v1 = vmov 0  }
  0x28   : > { %565 = vmatprep.subr.bf16.mxu0 %v793_v0  ;;  %569 = vmatprep.mubr.msk.bf16.mxu0 %vm794_vm0, %v793_v0  ;;  %v650_v2 = vld [vmem:[#allocation2 + $0x8] sm:$0xff]   ;;  %v651_v3 = vld [vmem:[#allocation2] sm:$0xff]   ;;  %vm312_vm1 = vcmask 261120   ;;  %s913_s8 = sand.u32 1, %s772_s19   ;;  %s558_s12 = sshll.u32 %s780_s21, 6 }
  0x29   : > { %649 = vset.pattern.permute.xlu0 %v795_v1  ;;  %s277_s16 = scalar_select %p276_p12, %s780_s21, 1  ;;  %566 = vmatpush3.bf16.msra.mxu0 %v650_v2  ;;  %v357_v4 = vld [vmem:[%s985_s3] sm:$0xff] }
  0x2a   : > { %567 = vmatprep.subr.bf16.mxu0 %v793_v0  ;;  %360 = vperm.xlu0 %649, %v357_v4   ;;  %v553_v6 = vld [vmem:[%s984_s2] ss:$0 sm:$0xff]  ;;  %s551_s11 = sshll.u32 %s913_s8, 2  ;;  %s386_s24 = scalar_lea.sflag [#allocation4], %s913_s8 }
  0x2b   : > { %s552_s17 = sshll.u32 %s277_s16, 2  ;;  %s269_s13 = scalar_lea.vmem [#allocation5], %s551_s11 }
  0x2c   : > { %s282_s7 = scalar_lea.vmem %s982_s0, %s552_s17  ;;  %s404_s14 = sshll.u32 %s269_s13, 4  ;;  %s405_s14 = int_to_ptr.vmem [resolvable:$true] %s404_s14 }
  0x2d   : > { %568 = vmatpush3.bf16.msra.mxu0 %v651_v3  ;;  %v288_v5 = vld [vmem:[%s282_s7] sm:$0xf]  ;;  %s923_s17 = scalar_lea.hbm %s986_s4, %s558_s12  ;;  %s678_s25 = scalar_lea.vmem %s405_s14, 64 }
  0x2e   : > { %p679_p10 = scmp.ne.s32.totalorder %s405_s14, %s678_s25  ;;  %s796_s27 = smov [#allocation5]  }
  0x2f   : > { %s682_s29 = sshll.u32 %s796_s27, 4  ;;  %s683_s29 = int_to_ptr.vmem [resolvable:$false] %s682_s29 }
  0x30   : > { %570 = vmatmul.mubr.msk.bf16.vlgmr.msra.gmra.mxu0 %vm312_vm1, %v288_v5  ;;  %p680_p11 = pnand %p679_p10, %p868_p4  ;;  %s684_s7 = scalar_lea.vmem %s683_s29, 128 }
  0x31   : > { %p685_p0 = scmp.lt.s32.totalorder %s405_s14, %s683_s29  ;;  %p686_p1 = scmp.lt.s32.totalorder %s684_s7, %s678_s25 }
  0x32   : > { %p681_p13 = pneg %p680_p11 }
  0x33   : > { %p687_p2 = por %p686_p1, %p685_p0 }
  0x35   : > { %p688_p3 = pnand %p687_p2, %p681_p13 }
  0xa5   : > { %v361_v10 = vpop.permute.xlu0 %360 }
  0xf0   : > { %v350_v7 = vpop.f32.mrf.mxu0 }
  0xf1   : > { %v351_v8 = vadd.f32 %v553_v6, %v350_v7 }
  0xf2   : > { %v571_v9 = vpop.f32.mrf.mxu0 }
  0xf3   : > { %v356_v11 = vmax.f32 %v351_v8, 0.0 }
  0xf4   : > { %v353_v12 = vpop.f32.mrf.mxu0 }
  0xf5   : > { %v363_v13 = vmul.f32 %v361_v10, %v356_v11 }
  0xf6   : > { %v572_v14 = vpop.f32.mrf.mxu0 }
  0xf7   : > { %v364_v15 = vpack.c.bf16 %v363_v13, %v363_v13  ;;  %v366_v16 = vrot.slane %v363_v13, 4 }
  0xf9   : > { %v367_v17 = vadd.f32 %v366_v16, %v363_v13  ;;  %365 = vst [vmem:[%s269_s13] sm:$0xf] %v364_v15 }
  0xfa   : > { %691 = shalt.err (!%p688_p3)
}
  0xfb   : > { %s692_s9 = scalar_lea.hbm %s923_s17, 64  ;;  %s696_s12 = scalar_lea.hbm %s986_s4, 128 }
  0xfc   : > { %p693_p5 = scmp.ne.s32.totalorder %s923_s17, %s692_s9  ;;  %p697_p9 = scmp.lt.s32.totalorder %s923_s17, %s986_s4 }
  0xfd   : > { %p698_p12 = scmp.lt.s32.totalorder %s696_s12, %s692_s9 }
  0xfe   : > { %p694_p6 = pnand %p693_p5, %p868_p4 }
  0xff   : > { %p699_p10 = por %p698_p12, %p697_p9 }
 0x100   : > { %p695_p7 = pneg %p694_p6 }
 0x102   : > { %p700_p11 = pnand %p699_p10, %p695_p7 }
 0x104   : > { %703 = shalt.err (!%p700_p11)
}
 0x105   : > { %577 = dma.vmem_to_hbm [thread:$0]  (%p868_p4), %s405_s14, 64, %s923_s17, %s386_s24   ;;  %v368_v18 = vrot.slane %v367_v17, 2 }
 0x106   : > { %s559_s16 = sshll.u32 %s780_s21, 4  ;;  %s275_s25 = scalar_lea.vmem [#allocation6], %s913_s8 }
 0x107   : > { %v369_v19 = vadd.f32 %v368_v18, %v367_v17  ;;  %s417_s27 = sshll.u32 %s275_s25, 4  ;;  %s415_s9 = scalar_lea.hbm %s987_s5, %s559_s16  ;;  %s418_s27 = int_to_ptr.vmem [resolvable:$true] %s417_s27 }
 0x108   : > { %s391_s10 = scalar_lea.sflag [#allocation7], %s913_s8  ;;  %s704_s11 = scalar_lea.vmem %s418_s27, 16 }
 0x109   : > { %v370_v20 = vrot.slane %v369_v19, 1  ;;  %p705_p13 = scmp.ne.s32.totalorder %s418_s27, %s704_s11  ;;  %s797_s14 = smov [#allocation6]  }
 0x10a   : > { %s708_s17 = sshll.u32 %s797_s14, 4  ;;  %s709_s17 = int_to_ptr.vmem [resolvable:$false] %s708_s17 }
 0x10b   : > { %v371_v21 = vadd.f32 %v370_v20, %v369_v19  ;;  %p706_p0 = pnand %p705_p13, %p868_p4  ;;  %s710_s21 = scalar_lea.vmem %s709_s17, 32 }
 0x10c   : > { %p711_p2 = scmp.lt.s32.totalorder %s418_s27, %s709_s17  ;;  %p712_p3 = scmp.lt.s32.totalorder %s710_s21, %s704_s11 }
 0x10d   : > { %v372_v22 = vmul.f32 0.125, %v371_v21  ;;  %p707_p1 = pneg %p706_p0 }
 0x10e   : > { %p713_p5 = por %p712_p3, %p711_p2 }
 0x10f   : > { %377 = vst [vmem:[%s275_s25] sm:$0x1] %v372_v22 }
 0x110   : > { %p714_p6 = pnand %p713_p5, %p707_p1 }
 0x112   : > { %717 = shalt.err (!%p714_p6)
}
 0x113   : > { %s718_s24 = scalar_lea.hbm %s415_s9, 16  ;;  %s722_s13 = scalar_lea.hbm %s987_s5, 32 }
 0x114   : > { %p719_p7 = scmp.ne.s32.totalorder %s415_s9, %s718_s24  ;;  %p723_p10 = scmp.lt.s32.totalorder %s415_s9, %s987_s5 }
 0x115   : > { %p724_p11 = scmp.lt.s32.totalorder %s722_s13, %s718_s24 }
 0x116   : > { %p720_p9 = pnand %p719_p7, %p868_p4 }
 0x117   : > { %p725_p13 = por %p724_p11, %p723_p10 }
 0x118   : > { %p721_p12 = pneg %p720_p9 }
 0x11a   : > { %p726_p0 = pnand %p725_p13, %p721_p12 }
 0x11c   : > { %729 = shalt.err (!%p726_p0)
}
 0x11d   : > { %578 = dma.vmem_to_hbm [thread:$0]  (%p868_p4), %s418_s27, 16, %s415_s9, %s391_s10  }
 0x11e PF: > { %p594_p1 = scmp.ge.s32.totalorder %s788_s23, 2  ;;  %s429_s25 = sand.u32 1, %s768_s18  }
 0x11f   : > { %s430_s29 = scalar_lea.sflag [#allocation4], %s429_s25 }
 0x120   : > { %p586_p2 = pnand %p594_p1, %p875_p8 }
 0x122   : > { %p587_p3 = pneg %p586_p2 }
 0x124   : > { %759 = dma.done.wait (%p587_p3), %s430_s29, 64  }
 0x125   : > { %761 = vsyncadd (%p587_p3), %s430_s29, 4294967232  ;;  %s439_s7 = scalar_lea.sflag [#allocation7], %s429_s25 }
 0x126   : > { %763 = dma.done.wait (%p587_p3), %s439_s7, 16  }
 0x127   : > { %765 = vsyncadd (%p587_p3), %s439_s7, 4294967280  ;;  %s23_s23 = sadd.s32 1, %s788_s23   ;;  %s992_s18 = smov %s772_s19 }
 0x128   : > { %p20_p5 = scmp.ge.s32.totalorder %s23_s23, 4   ;;  %s993_s19 = smov %s776_s20 }
 0x129   : > { %s994_s20 = smov %s881_s6  ;;  %s995_s21 = smov %s784_s22 }
 0x12a   : > { %s996_s22 = smov %s998_s26  ;;  %22 = sbr.rel (!%p20_p5) target bundleno = 7 (0x7), region = 104 }
 0x12f   :  { %443 = vsyncpa [#allocation3], 1 }
 0x130   :  { %445 = vsyncpa [#allocation3 + $0x1], 1 }
 0x131   :  { %446 = vsyncpa [#allocation4], 1 }
 0x132   :  { %448 = vsyncpa [#allocation4 + $0x1], 1 }
 0x133   :  { %449 = vsyncpa [#allocation7], 1 }
 0x134   :  { %451 = vsyncpa [#allocation7 + $0x1], 1 }

</bundles_post_ra>
